<compile_context>
chip_gen: v6e
topology: v6e:2x2x1
jax: 0.10.0
libtpu: 0.0.40
codegen_flags: <defaults>
</compile_context>

<pallas_src>
import jax
import jax.numpy as jnp
from jax.experimental import pallas as pl
from jax.experimental.pallas import tpu as pltpu

BN_EPS = 1e-5
LN_EPS = 1e-5
DOT_DTYPE = jnp.bfloat16   # MXU-native operand dtype; accumulation is f32.


# ----------------------------- in-kernel math ------------------------------
def _erf_approx(x):
    # Abramowitz & Stegun 7.1.26 rational approximation (|err| < 1.5e-7);
    # built only from exp/mul/add/div so it lowers cleanly on VPU/EUP.
    a1, a2, a3, a4, a5 = 0.254829592, -0.284496736, 1.421413741, -1.453152027, 1.061405429
    p = 0.3275911
    sign = jnp.where(x >= 0.0, 1.0, -1.0)
    ax = jnp.abs(x)
    t = 1.0 / (1.0 + p * ax)
    poly = ((((a5 * t + a4) * t + a3) * t + a2) * t + a1) * t
    return sign * (1.0 - poly * jnp.exp(-ax * ax))


def _gelu(x):
    # PyTorch nn.GELU() default (erf form).
    return 0.5 * x * (1.0 + _erf_approx(x * 0.7071067811865476))


def _layernorm(x, gamma, beta):
    mu = jnp.mean(x, axis=-1, keepdims=True)
    var = jnp.mean((x - mu) ** 2, axis=-1, keepdims=True)
    return (x - mu) * jax.lax.rsqrt(var + LN_EPS) * gamma + beta


# ------------------------------ fused kernel --------------------------------
def _fused_kernel(x_ref, m1_ref, c1_ref, m2_ref, c2_ref, m3_ref, c3_ref,
                  rel_ref, wv_ref, lna_g_ref, lna_b_ref,
                  ln1_g_ref, ln1_b_ref, w1_ref, fb1_ref, w2_ref, fb2_ref,
                  ln2_g_ref, ln2_b_ref, wc_ref, bc_ref,
                  rep_ref, cls_ref):
    def mm(a_f32, w_ref_):
        # bf16 operands, f32 accumulation on the MXU.
        return jnp.dot(a_f32.astype(DOT_DTYPE), w_ref_[...],
                       preferred_element_type=jnp.float32)

    # --- three causal conv + BN + GELU stages (conv as folded Toeplitz matmul)
    x = x_ref[...]                                        # (B, C_in*L) f32
    y1 = _gelu(mm(x, m1_ref) + c1_ref[...])               # (B, L1*E)
    y2 = _gelu(mm(y1, m2_ref) + c2_ref[...])              # (B, L2*E)
    y3 = _gelu(mm(y2, m3_ref) + c3_ref[...])              # (B, L3*R)

    # --- GAP over time; columns of y3 are ordered (t, c) with c fastest.
    R = rep_ref.shape[-1]
    L3 = y3.shape[-1] // R
    g = y3[:, 0:R]
    for t in range(1, L3):                                # static unroll, tiny
        g = g + y3[:, t * R:(t + 1) * R]
    g = g * (1.0 / L3)                                    # (B, R)

    # --- Attention_Rel_Scl with seq_len == 1: softmax over one key is 1, so
    # attention weight = 1 + relative_bias[head]; Q/K projections drop out.
    v = mm(g, wv_ref)
    attn_out = _layernorm(v * rel_ref[...], lna_g_ref[...], lna_b_ref[...])

    att = _layernorm(g + attn_out, ln1_g_ref[...], ln1_b_ref[...])

    # --- FeedForward (Linear -> ReLU -> Linear), dropout = identity (eval).
    h = jnp.maximum(mm(att, w1_ref) + fb1_ref[...], 0.0)
    ff = mm(h, w2_ref) + fb2_ref[...]

    out = _layernorm(att + ff, ln2_g_ref[...], ln2_b_ref[...])

    rep_ref[...] = out
    # num_classes < 128 -> inherently a masked partial store; unavoidable
    # given the model's output width.
    cls_ref[...] = mm(out, wc_ref) + bc_ref[...]


# ------------------------- parameter construction ---------------------------
def make_conv_params(key, c_in, c_out, k):
    ks = jax.random.split(key, 6)
    w = jax.random.normal(ks[0], (c_out, c_in, k), jnp.float32) / jnp.sqrt(c_in * k)
    b = 0.05 * jax.random.normal(ks[1], (c_out,), jnp.float32)
    gamma = 1.0 + 0.1 * jax.random.normal(ks[2], (c_out,), jnp.float32)
    beta = 0.05 * jax.random.normal(ks[3], (c_out,), jnp.float32)
    mean = 0.05 * jax.random.normal(ks[4], (c_out,), jnp.float32)
    var = 1.0 + 0.5 * jax.random.uniform(ks[5], (c_out,), jnp.float32)
    return dict(w=w, b=b, gamma=gamma, beta=beta, mean=mean, var=var)


def make_head_params(key, rep_size, num_heads, dim_ff, num_classes):
    ks = jax.random.split(key, 12)
    head_dim = rep_size // num_heads
    rel_table = 0.1 * jax.random.normal(ks[0], (num_heads,), jnp.float32)
    rel_scale = 1.0 + jnp.repeat(rel_table, head_dim)             # (rep_size,)
    n = lambda k_, shape, scale: scale * jax.random.normal(k_, shape, jnp.float32)
    return dict(
        rel_scale=rel_scale,
        wv=n(ks[1], (rep_size, rep_size), rep_size ** -0.5),
        lna_g=1.0 + 0.1 * jax.random.normal(ks[2], (rep_size,), jnp.float32),
        lna_b=n(ks[3], (rep_size,), 0.05),
        ln1_g=1.0 + 0.1 * jax.random.normal(ks[4], (rep_size,), jnp.float32),
        ln1_b=n(ks[5], (rep_size,), 0.05),
        w1=n(ks[6], (rep_size, dim_ff), rep_size ** -0.5),
        b1=n(ks[7], (dim_ff,), 0.05),
        w2=n(ks[8], (dim_ff, rep_size), dim_ff ** -0.5),
        b2=n(ks[9], (rep_size,), 0.05),
        ln2_g=1.0 + 0.1 * jax.random.normal(ks[10], (rep_size,), jnp.float32),
        ln2_b=n(ks[11], (rep_size,), 0.05),
        wc=n(jax.random.fold_in(key, 100), (rep_size, num_classes), rep_size ** -0.5),
        bc=n(jax.random.fold_in(key, 101), (num_classes,), 0.05),
    )


# ---------------------- trace-time folding (constants) ----------------------
def fold_conv_stage(p, L_in, k, stride, dilation, ncl_input=False):
    """Fold causal pad + im2col + Conv1d + inference BatchNorm1d into one
    dense matrix M: y_flat = x_flat @ M + bias, with x_flat flattened NCL
    (stage 1) or (t, c)-channels-fastest (later stages), and y_flat flattened
    (t, c) channels-fastest.  Trace-time constant math; exact."""
    w, b = p["w"], p["b"]
    C_out, C_in, K = w.shape
    assert K == k
    pad = (K - 1) * dilation
    L_out = (L_in - 1) // stride + 1
    # src[t, j]: input position feeding output t through tap j (< 0 => causal zero pad)
    src = (jnp.arange(L_out)[:, None] * stride
           + jnp.arange(K)[None, :] * dilation - pad)               # (L_out, K)
    onehot = (jnp.arange(L_in)[:, None, None] == src[None, :, :]).astype(jnp.float32)
    # (L_in, L_out, K) x (C_out, C_in, K) -> conv Toeplitz matrix
    order = 'mtj,oij->imto' if ncl_input else 'mtj,oij->mito'
    m4 = jnp.einsum(order, onehot, w)
    M = m4.reshape(L_in * C_in, L_out * C_out)
    # Fold BatchNorm (running stats) into the matrix / bias.
    scale = p["gamma"] * jax.lax.rsqrt(p["var"] + BN_EPS)
    shift = p["beta"] - p["mean"] * scale
    M = M * jnp.tile(scale, L_out)[None, :]
    bias = jnp.tile(b * scale + shift, L_out).reshape(1, L_out * C_out)
    return M.astype(DOT_DTYPE), bias.astype(jnp.float32), L_out


def fold_head_params(hp):
    vec = lambda a: a.reshape(1, -1).astype(jnp.float32)
    return dict(
        rel=vec(hp["rel_scale"]),
        wv=hp["wv"].astype(DOT_DTYPE),
        lna_g=vec(hp["lna_g"]), lna_b=vec(hp["lna_b"]),
        ln1_g=vec(hp["ln1_g"]), ln1_b=vec(hp["ln1_b"]),
        w1=hp["w1"].astype(DOT_DTYPE), fb1=vec(hp["b1"]),
        w2=hp["w2"].astype(DOT_DTYPE), fb2=vec(hp["b2"]),
        ln2_g=vec(hp["ln2_g"]), ln2_b=vec(hp["ln2_b"]),
        wc=hp["wc"].astype(DOT_DTYPE), bc=vec(hp["bc"]),
    )


# ------------------------------- full forward -------------------------------
def conv_model_forward(x_ncl, p1, p2, p3, hp, num_classes):
    B, C_in, L = x_ncl.shape
    m1, c1, L1 = fold_conv_stage(p1, L, k=8, stride=2, dilation=1, ncl_input=True)
    m2, c2, L2 = fold_conv_stage(p2, L1, k=5, stride=2, dilation=2)
    m3, c3, L3 = fold_conv_stage(p3, L2, k=3, stride=2, dilation=2)
    h = fold_head_params(hp)
    R = hp["ln2_g"].shape[0]

    # NCL flatten only (stage-1 matrix is built for this ordering); no transpose.
    x_flat = x_ncl.reshape(B, C_in * L).astype(jnp.float32)

    operands = [x_flat, m1, c1, m2, c2, m3, c3,
                h["rel"], h["wv"], h["lna_g"], h["lna_b"],
                h["ln1_g"], h["ln1_b"], h["w1"], h["fb1"],
                h["w2"], h["fb2"], h["ln2_g"], h["ln2_b"],
                h["wc"], h["bc"]]

    vspec = lambda: pl.BlockSpec(memory_space=pltpu.MemorySpace.VMEM)
    rep, cls = pl.pallas_call(
        _fused_kernel,
        out_shape=(jax.ShapeDtypeStruct((B, R), jnp.float32),
                   jax.ShapeDtypeStruct((B, num_classes), jnp.float32)),
        in_specs=[vspec() for _ in operands],
        out_specs=(vspec(), vspec()),
    )(*operands)
    return rep, cls


if __name__ == "__main__":
    # config: Data_shape=(B, channels, seq_len)
    B, channel_size, seq_len = 2, 4, 16
    emb_size, rep_size = 32, 32     # FeedForward requires emb_size == rep_size
    num_heads, dim_ff, num_classes = 4, 64, 5

    key = jax.random.PRNGKey(0)
    k_x, k_c1, k_c2, k_c3, k_h = jax.random.split(key, 5)

    x = jax.random.normal(k_x, (B, channel_size, seq_len), jnp.float32)  # NCL like PyTorch
    p1 = make_conv_params(k_c1, channel_size, emb_size, k=8)
    p2 = make_conv_params(k_c2, emb_size, emb_size, k=5)
    p3 = make_conv_params(k_c3, emb_size, rep_size, k=3)
    hp = make_head_params(k_h, rep_size, num_heads, dim_ff, num_classes)

    rep_out, c_out = conv_model_forward(x, p1, p2, p3, hp, num_classes)
    jax.block_until_ready((rep_out, c_out))
    assert rep_out.shape == (B, rep_size) and c_out.shape == (B, num_classes)
    print("KERNEL_OK")
</pallas_src>

<mosaic_0001>
module attributes {stable_mosaic.version = 11 : i64} {
  func.func @_fused_kernel(%arg0: memref<2x64xf32, #tpu.memory_space<vmem>>, %arg1: memref<64x256xbf16, #tpu.memory_space<vmem>>, %arg2: memref<1x256xf32, #tpu.memory_space<vmem>>, %arg3: memref<256x128xbf16, #tpu.memory_space<vmem>>, %arg4: memref<1x128xf32, #tpu.memory_space<vmem>>, %arg5: memref<128x64xbf16, #tpu.memory_space<vmem>>, %arg6: memref<1x64xf32, #tpu.memory_space<vmem>>, %arg7: memref<1x32xf32, #tpu.memory_space<vmem>>, %arg8: memref<32x32xbf16, #tpu.memory_space<vmem>>, %arg9: memref<1x32xf32, #tpu.memory_space<vmem>>, %arg10: memref<1x32xf32, #tpu.memory_space<vmem>>, %arg11: memref<1x32xf32, #tpu.memory_space<vmem>>, %arg12: memref<1x32xf32, #tpu.memory_space<vmem>>, %arg13: memref<32x64xbf16, #tpu.memory_space<vmem>>, %arg14: memref<1x64xf32, #tpu.memory_space<vmem>>, %arg15: memref<64x32xbf16, #tpu.memory_space<vmem>>, %arg16: memref<1x32xf32, #tpu.memory_space<vmem>>, %arg17: memref<1x32xf32, #tpu.memory_space<vmem>>, %arg18: memref<1x32xf32, #tpu.memory_space<vmem>>, %arg19: memref<32x5xbf16, #tpu.memory_space<vmem>>, %arg20: memref<1x5xf32, #tpu.memory_space<vmem>>, %arg21: memref<2x32xf32, #tpu.memory_space<vmem>>, %arg22: memref<2x5xf32, #tpu.memory_space<vmem>>) attributes {dimension_semantics = [], scalar_prefetch = 0 : i64, scratch_operands = 0 : i64, tpu.core_type = #tpu.core_type<tc>} {
    %c0 = arith.constant 0 : index
    %c0_0 = arith.constant 0 : index
    %0 = vector.load %arg0[%c0, %c0_0] : memref<2x64xf32, #tpu.memory_space<vmem>>, vector<2x64xf32>
    %1 = arith.truncf %0 : vector<2x64xf32> to vector<2x64xbf16>
    %c0_1 = arith.constant 0 : index
    %c0_2 = arith.constant 0 : index
    %2 = vector.load %arg1[%c0_1, %c0_2] : memref<64x256xbf16, #tpu.memory_space<vmem>>, vector<64x256xbf16>
    %cst = arith.constant dense<0.000000e+00> : vector<2x256xf32>
    %3 = tpu.matmul %1, %2, %cst {dimension_numbers = #tpu.dot_dimension_numbers<[1], [0], [0], [1], [0, 0, 1, 1], [], []>} : vector<2x64xbf16>, vector<64x256xbf16>, vector<2x256xf32> -> vector<2x256xf32>
    %c0_3 = arith.constant 0 : index
    %c0_4 = arith.constant 0 : index
    %4 = vector.load %arg2[%c0_3, %c0_4] : memref<1x256xf32, #tpu.memory_space<vmem>>, vector<1x256xf32>
    %5 = vector.broadcast %4 : vector<1x256xf32> to vector<2x256xf32>
    %6 = arith.addf %3, %5 : vector<2x256xf32>
    %cst_5 = arith.constant 5.000000e-01 : f32
    %7 = vector.broadcast %cst_5 : f32 to vector<2x256xf32>
    %8 = arith.mulf %7, %6 : vector<2x256xf32>
    %cst_6 = arith.constant 0.707106769 : f32
    %9 = vector.broadcast %cst_6 : f32 to vector<2x256xf32>
    %10 = arith.mulf %6, %9 : vector<2x256xf32>
    %cst_7 = arith.constant 0.000000e+00 : f32
    %11 = vector.broadcast %cst_7 : f32 to vector<2x256xf32>
    %12 = arith.cmpf oge, %10, %11 : vector<2x256xf32>
    %cst_8 = arith.constant 1.000000e+00 : f32
    %cst_9 = arith.constant -1.000000e+00 : f32
    %13 = vector.broadcast %cst_8 : f32 to vector<2x256xf32>
    %14 = vector.broadcast %cst_9 : f32 to vector<2x256xf32>
    %15 = arith.select %12, %13, %14 : vector<2x256xi1>, vector<2x256xf32>
    %16 = math.absf %10 : vector<2x256xf32>
    %cst_10 = arith.constant 0.327591091 : f32
    %17 = vector.broadcast %cst_10 : f32 to vector<2x256xf32>
    %18 = arith.mulf %17, %16 : vector<2x256xf32>
    %cst_11 = arith.constant 1.000000e+00 : f32
    %19 = vector.broadcast %cst_11 : f32 to vector<2x256xf32>
    %20 = arith.addf %19, %18 : vector<2x256xf32>
    %cst_12 = arith.constant 1.000000e+00 : f32
    %21 = vector.broadcast %cst_12 : f32 to vector<2x256xf32>
    %22 = arith.divf %21, %20 : vector<2x256xf32>
    %cst_13 = arith.constant 1.06140542 : f32
    %23 = vector.broadcast %cst_13 : f32 to vector<2x256xf32>
    %24 = arith.mulf %23, %22 : vector<2x256xf32>
    %cst_14 = arith.constant -1.45315206 : f32
    %25 = vector.broadcast %cst_14 : f32 to vector<2x256xf32>
    %26 = arith.addf %24, %25 : vector<2x256xf32>
    %27 = arith.mulf %26, %22 : vector<2x256xf32>
    %cst_15 = arith.constant 1.42141378 : f32
    %28 = vector.broadcast %cst_15 : f32 to vector<2x256xf32>
    %29 = arith.addf %27, %28 : vector<2x256xf32>
    %30 = arith.mulf %29, %22 : vector<2x256xf32>
    %cst_16 = arith.constant -0.284496725 : f32
    %31 = vector.broadcast %cst_16 : f32 to vector<2x256xf32>
    %32 = arith.addf %30, %31 : vector<2x256xf32>
    %33 = arith.mulf %32, %22 : vector<2x256xf32>
    %cst_17 = arith.constant 0.254829586 : f32
    %34 = vector.broadcast %cst_17 : f32 to vector<2x256xf32>
    %35 = arith.addf %33, %34 : vector<2x256xf32>
    %36 = arith.mulf %35, %22 : vector<2x256xf32>
    %cst_18 = arith.constant 0.000000e+00 : f32
    %37 = vector.broadcast %cst_18 : f32 to vector<2x256xf32>
    %38 = arith.subf %37, %16 : vector<2x256xf32>
    %39 = arith.mulf %38, %16 : vector<2x256xf32>
    %40 = math.exp %39 : vector<2x256xf32>
    %41 = arith.mulf %36, %40 : vector<2x256xf32>
    %cst_19 = arith.constant 1.000000e+00 : f32
    %42 = vector.broadcast %cst_19 : f32 to vector<2x256xf32>
    %43 = arith.subf %42, %41 : vector<2x256xf32>
    %44 = arith.mulf %15, %43 : vector<2x256xf32>
    %cst_20 = arith.constant 1.000000e+00 : f32
    %45 = vector.broadcast %cst_20 : f32 to vector<2x256xf32>
    %46 = arith.addf %45, %44 : vector<2x256xf32>
    %47 = arith.mulf %8, %46 : vector<2x256xf32>
    %48 = arith.truncf %47 : vector<2x256xf32> to vector<2x256xbf16>
    %c0_21 = arith.constant 0 : index
    %c0_22 = arith.constant 0 : index
    %49 = vector.load %arg3[%c0_21, %c0_22] : memref<256x128xbf16, #tpu.memory_space<vmem>>, vector<256x128xbf16>
    %cst_23 = arith.constant dense<0.000000e+00> : vector<2x128xf32>
    %50 = tpu.matmul %48, %49, %cst_23 {dimension_numbers = #tpu.dot_dimension_numbers<[1], [0], [0], [1], [0, 0, 1, 1], [], []>} : vector<2x256xbf16>, vector<256x128xbf16>, vector<2x128xf32> -> vector<2x128xf32>
    %c0_24 = arith.constant 0 : index
    %c0_25 = arith.constant 0 : index
    %51 = vector.load %arg4[%c0_24, %c0_25] : memref<1x128xf32, #tpu.memory_space<vmem>>, vector<1x128xf32>
    %52 = vector.broadcast %51 : vector<1x128xf32> to vector<2x128xf32>
    %53 = arith.addf %50, %52 : vector<2x128xf32>
    %cst_26 = arith.constant 5.000000e-01 : f32
    %54 = vector.broadcast %cst_26 : f32 to vector<2x128xf32>
    %55 = arith.mulf %54, %53 : vector<2x128xf32>
    %cst_27 = arith.constant 0.707106769 : f32
    %56 = vector.broadcast %cst_27 : f32 to vector<2x128xf32>
    %57 = arith.mulf %53, %56 : vector<2x128xf32>
    %cst_28 = arith.constant 0.000000e+00 : f32
    %58 = vector.broadcast %cst_28 : f32 to vector<2x128xf32>
    %59 = arith.cmpf oge, %57, %58 : vector<2x128xf32>
    %cst_29 = arith.constant 1.000000e+00 : f32
    %cst_30 = arith.constant -1.000000e+00 : f32
    %60 = vector.broadcast %cst_29 : f32 to vector<2x128xf32>
    %61 = vector.broadcast %cst_30 : f32 to vector<2x128xf32>
    %62 = arith.select %59, %60, %61 : vector<2x128xi1>, vector<2x128xf32>
    %63 = math.absf %57 : vector<2x128xf32>
    %cst_31 = arith.constant 0.327591091 : f32
    %64 = vector.broadcast %cst_31 : f32 to vector<2x128xf32>
    %65 = arith.mulf %64, %63 : vector<2x128xf32>
    %cst_32 = arith.constant 1.000000e+00 : f32
    %66 = vector.broadcast %cst_32 : f32 to vector<2x128xf32>
    %67 = arith.addf %66, %65 : vector<2x128xf32>
    %cst_33 = arith.constant 1.000000e+00 : f32
    %68 = vector.broadcast %cst_33 : f32 to vector<2x128xf32>
    %69 = arith.divf %68, %67 : vector<2x128xf32>
    %cst_34 = arith.constant 1.06140542 : f32
    %70 = vector.broadcast %cst_34 : f32 to vector<2x128xf32>
    %71 = arith.mulf %70, %69 : vector<2x128xf32>
    %cst_35 = arith.constant -1.45315206 : f32
    %72 = vector.broadcast %cst_35 : f32 to vector<2x128xf32>
    %73 = arith.addf %71, %72 : vector<2x128xf32>
    %74 = arith.mulf %73, %69 : vector<2x128xf32>
    %cst_36 = arith.constant 1.42141378 : f32
    %75 = vector.broadcast %cst_36 : f32 to vector<2x128xf32>
    %76 = arith.addf %74, %75 : vector<2x128xf32>
    %77 = arith.mulf %76, %69 : vector<2x128xf32>
    %cst_37 = arith.constant -0.284496725 : f32
    %78 = vector.broadcast %cst_37 : f32 to vector<2x128xf32>
    %79 = arith.addf %77, %78 : vector<2x128xf32>
    %80 = arith.mulf %79, %69 : vector<2x128xf32>
    %cst_38 = arith.constant 0.254829586 : f32
    %81 = vector.broadcast %cst_38 : f32 to vector<2x128xf32>
    %82 = arith.addf %80, %81 : vector<2x128xf32>
    %83 = arith.mulf %82, %69 : vector<2x128xf32>
    %cst_39 = arith.constant 0.000000e+00 : f32
    %84 = vector.broadcast %cst_39 : f32 to vector<2x128xf32>
    %85 = arith.subf %84, %63 : vector<2x128xf32>
    %86 = arith.mulf %85, %63 : vector<2x128xf32>
    %87 = math.exp %86 : vector<2x128xf32>
    %88 = arith.mulf %83, %87 : vector<2x128xf32>
    %cst_40 = arith.constant 1.000000e+00 : f32
    %89 = vector.broadcast %cst_40 : f32 to vector<2x128xf32>
    %90 = arith.subf %89, %88 : vector<2x128xf32>
    %91 = arith.mulf %62, %90 : vector<2x128xf32>
    %cst_41 = arith.constant 1.000000e+00 : f32
    %92 = vector.broadcast %cst_41 : f32 to vector<2x128xf32>
    %93 = arith.addf %92, %91 : vector<2x128xf32>
    %94 = arith.mulf %55, %93 : vector<2x128xf32>
    %95 = arith.truncf %94 : vector<2x128xf32> to vector<2x128xbf16>
    %c0_42 = arith.constant 0 : index
    %c0_43 = arith.constant 0 : index
    %96 = vector.load %arg5[%c0_42, %c0_43] : memref<128x64xbf16, #tpu.memory_space<vmem>>, vector<128x64xbf16>
    %cst_44 = arith.constant dense<0.000000e+00> : vector<2x64xf32>
    %97 = tpu.matmul %95, %96, %cst_44 {dimension_numbers = #tpu.dot_dimension_numbers<[1], [0], [0], [1], [0, 0, 1, 1], [], []>} : vector<2x128xbf16>, vector<128x64xbf16>, vector<2x64xf32> -> vector<2x64xf32>
    %c0_45 = arith.constant 0 : index
    %c0_46 = arith.constant 0 : index
    %98 = vector.load %arg6[%c0_45, %c0_46] : memref<1x64xf32, #tpu.memory_space<vmem>>, vector<1x64xf32>
    %99 = vector.broadcast %98 : vector<1x64xf32> to vector<2x64xf32>
    %100 = arith.addf %97, %99 : vector<2x64xf32>
    %cst_47 = arith.constant 5.000000e-01 : f32
    %101 = vector.broadcast %cst_47 : f32 to vector<2x64xf32>
    %102 = arith.mulf %101, %100 : vector<2x64xf32>
    %cst_48 = arith.constant 0.707106769 : f32
    %103 = vector.broadcast %cst_48 : f32 to vector<2x64xf32>
    %104 = arith.mulf %100, %103 : vector<2x64xf32>
    %cst_49 = arith.constant 0.000000e+00 : f32
    %105 = vector.broadcast %cst_49 : f32 to vector<2x64xf32>
    %106 = arith.cmpf oge, %104, %105 : vector<2x64xf32>
    %cst_50 = arith.constant 1.000000e+00 : f32
    %cst_51 = arith.constant -1.000000e+00 : f32
    %107 = vector.broadcast %cst_50 : f32 to vector<2x64xf32>
    %108 = vector.broadcast %cst_51 : f32 to vector<2x64xf32>
    %109 = arith.select %106, %107, %108 : vector<2x64xi1>, vector<2x64xf32>
    %110 = math.absf %104 : vector<2x64xf32>
    %cst_52 = arith.constant 0.327591091 : f32
    %111 = vector.broadcast %cst_52 : f32 to vector<2x64xf32>
    %112 = arith.mulf %111, %110 : vector<2x64xf32>
    %cst_53 = arith.constant 1.000000e+00 : f32
    %113 = vector.broadcast %cst_53 : f32 to vector<2x64xf32>
    %114 = arith.addf %113, %112 : vector<2x64xf32>
    %cst_54 = arith.constant 1.000000e+00 : f32
    %115 = vector.broadcast %cst_54 : f32 to vector<2x64xf32>
    %116 = arith.divf %115, %114 : vector<2x64xf32>
    %cst_55 = arith.constant 1.06140542 : f32
    %117 = vector.broadcast %cst_55 : f32 to vector<2x64xf32>
    %118 = arith.mulf %117, %116 : vector<2x64xf32>
    %cst_56 = arith.constant -1.45315206 : f32
    %119 = vector.broadcast %cst_56 : f32 to vector<2x64xf32>
    %120 = arith.addf %118, %119 : vector<2x64xf32>
    %121 = arith.mulf %120, %116 : vector<2x64xf32>
    %cst_57 = arith.constant 1.42141378 : f32
    %122 = vector.broadcast %cst_57 : f32 to vector<2x64xf32>
    %123 = arith.addf %121, %122 : vector<2x64xf32>
    %124 = arith.mulf %123, %116 : vector<2x64xf32>
    %cst_58 = arith.constant -0.284496725 : f32
    %125 = vector.broadcast %cst_58 : f32 to vector<2x64xf32>
    %126 = arith.addf %124, %125 : vector<2x64xf32>
    %127 = arith.mulf %126, %116 : vector<2x64xf32>
    %cst_59 = arith.constant 0.254829586 : f32
    %128 = vector.broadcast %cst_59 : f32 to vector<2x64xf32>
    %129 = arith.addf %127, %128 : vector<2x64xf32>
    %130 = arith.mulf %129, %116 : vector<2x64xf32>
    %cst_60 = arith.constant 0.000000e+00 : f32
    %131 = vector.broadcast %cst_60 : f32 to vector<2x64xf32>
    %132 = arith.subf %131, %110 : vector<2x64xf32>
    %133 = arith.mulf %132, %110 : vector<2x64xf32>
    %134 = math.exp %133 : vector<2x64xf32>
    %135 = arith.mulf %130, %134 : vector<2x64xf32>
    %cst_61 = arith.constant 1.000000e+00 : f32
    %136 = vector.broadcast %cst_61 : f32 to vector<2x64xf32>
    %137 = arith.subf %136, %135 : vector<2x64xf32>
    %138 = arith.mulf %109, %137 : vector<2x64xf32>
    %cst_62 = arith.constant 1.000000e+00 : f32
    %139 = vector.broadcast %cst_62 : f32 to vector<2x64xf32>
    %140 = arith.addf %139, %138 : vector<2x64xf32>
    %141 = arith.mulf %102, %140 : vector<2x64xf32>
    %142 = vector.extract_strided_slice %141 {offsets = [0, 0], sizes = [2, 32], strides = [1, 1]} : vector<2x64xf32> to vector<2x32xf32>
    %143 = vector.extract_strided_slice %141 {offsets = [0, 32], sizes = [2, 32], strides = [1, 1]} : vector<2x64xf32> to vector<2x32xf32>
    %144 = arith.addf %142, %143 : vector<2x32xf32>
    %cst_63 = arith.constant 5.000000e-01 : f32
    %145 = vector.broadcast %cst_63 : f32 to vector<2x32xf32>
    %146 = arith.mulf %144, %145 : vector<2x32xf32>
    %147 = arith.truncf %146 : vector<2x32xf32> to vector<2x32xbf16>
    %c0_64 = arith.constant 0 : index
    %c0_65 = arith.constant 0 : index
    %148 = vector.load %arg8[%c0_64, %c0_65] : memref<32x32xbf16, #tpu.memory_space<vmem>>, vector<32x32xbf16>
    %cst_66 = arith.constant dense<0.000000e+00> : vector<2x32xf32>
    %149 = tpu.matmul %147, %148, %cst_66 {dimension_numbers = #tpu.dot_dimension_numbers<[1], [0], [0], [1], [0, 0, 1, 1], [], []>} : vector<2x32xbf16>, vector<32x32xbf16>, vector<2x32xf32> -> vector<2x32xf32>
    %c0_67 = arith.constant 0 : index
    %c0_68 = arith.constant 0 : index
    %150 = vector.load %arg7[%c0_67, %c0_68] : memref<1x32xf32, #tpu.memory_space<vmem>>, vector<1x32xf32>
    %151 = vector.broadcast %150 : vector<1x32xf32> to vector<2x32xf32>
    %152 = arith.mulf %149, %151 : vector<2x32xf32>
    %c0_69 = arith.constant 0 : index
    %c0_70 = arith.constant 0 : index
    %153 = vector.load %arg9[%c0_69, %c0_70] : memref<1x32xf32, #tpu.memory_space<vmem>>, vector<1x32xf32>
    %c0_71 = arith.constant 0 : index
    %c0_72 = arith.constant 0 : index
    %154 = vector.load %arg10[%c0_71, %c0_72] : memref<1x32xf32, #tpu.memory_space<vmem>>, vector<1x32xf32>
    %cst_73 = arith.constant dense<0.000000e+00> : vector<2xf32>
    %155 = vector.multi_reduction <add>, %152, %cst_73 [1] : vector<2x32xf32> to vector<2xf32>
    %156 = vector.shape_cast %155 : vector<2xf32> to vector<2x1xf32>
    %cst_74 = arith.constant 3.200000e+01 : f32
    %157 = vector.broadcast %cst_74 : f32 to vector<2x1xf32>
    %158 = arith.divf %156, %157 : vector<2x1xf32>
    %159 = vector.broadcast %158 : vector<2x1xf32> to vector<2x32xf32>
    %160 = arith.subf %152, %159 : vector<2x32xf32>
    %161 = arith.mulf %160, %160 : vector<2x32xf32>
    %cst_75 = arith.constant dense<0.000000e+00> : vector<2xf32>
    %162 = vector.multi_reduction <add>, %161, %cst_75 [1] : vector<2x32xf32> to vector<2xf32>
    %163 = vector.shape_cast %162 : vector<2xf32> to vector<2x1xf32>
    %cst_76 = arith.constant 3.200000e+01 : f32
    %164 = vector.broadcast %cst_76 : f32 to vector<2x1xf32>
    %165 = arith.divf %163, %164 : vector<2x1xf32>
    %166 = vector.broadcast %158 : vector<2x1xf32> to vector<2x32xf32>
    %167 = arith.subf %152, %166 : vector<2x32xf32>
    %cst_77 = arith.constant 9.99999974E-6 : f32
    %168 = vector.broadcast %cst_77 : f32 to vector<2x1xf32>
    %169 = arith.addf %165, %168 : vector<2x1xf32>
    %170 = math.rsqrt %169 : vector<2x1xf32>
    %171 = vector.broadcast %170 : vector<2x1xf32> to vector<2x32xf32>
    %172 = arith.mulf %167, %171 : vector<2x32xf32>
    %173 = vector.broadcast %153 : vector<1x32xf32> to vector<2x32xf32>
    %174 = arith.mulf %172, %173 : vector<2x32xf32>
    %175 = vector.broadcast %154 : vector<1x32xf32> to vector<2x32xf32>
    %176 = arith.addf %174, %175 : vector<2x32xf32>
    %177 = arith.addf %146, %176 : vector<2x32xf32>
    %c0_78 = arith.constant 0 : index
    %c0_79 = arith.constant 0 : index
    %178 = vector.load %arg11[%c0_78, %c0_79] : memref<1x32xf32, #tpu.memory_space<vmem>>, vector<1x32xf32>
    %c0_80 = arith.constant 0 : index
    %c0_81 = arith.constant 0 : index
    %179 = vector.load %arg12[%c0_80, %c0_81] : memref<1x32xf32, #tpu.memory_space<vmem>>, vector<1x32xf32>
    %cst_82 = arith.constant dense<0.000000e+00> : vector<2xf32>
    %180 = vector.multi_reduction <add>, %177, %cst_82 [1] : vector<2x32xf32> to vector<2xf32>
    %181 = vector.shape_cast %180 : vector<2xf32> to vector<2x1xf32>
    %cst_83 = arith.constant 3.200000e+01 : f32
    %182 = vector.broadcast %cst_83 : f32 to vector<2x1xf32>
    %183 = arith.divf %181, %182 : vector<2x1xf32>
    %184 = vector.broadcast %183 : vector<2x1xf32> to vector<2x32xf32>
    %185 = arith.subf %177, %184 : vector<2x32xf32>
    %186 = arith.mulf %185, %185 : vector<2x32xf32>
    %cst_84 = arith.constant dense<0.000000e+00> : vector<2xf32>
    %187 = vector.multi_reduction <add>, %186, %cst_84 [1] : vector<2x32xf32> to vector<2xf32>
    %188 = vector.shape_cast %187 : vector<2xf32> to vector<2x1xf32>
    %cst_85 = arith.constant 3.200000e+01 : f32
    %189 = vector.broadcast %cst_85 : f32 to vector<2x1xf32>
    %190 = arith.divf %188, %189 : vector<2x1xf32>
    %191 = vector.broadcast %183 : vector<2x1xf32> to vector<2x32xf32>
    %192 = arith.subf %177, %191 : vector<2x32xf32>
    %cst_86 = arith.constant 9.99999974E-6 : f32
    %193 = vector.broadcast %cst_86 : f32 to vector<2x1xf32>
    %194 = arith.addf %190, %193 : vector<2x1xf32>
    %195 = math.rsqrt %194 : vector<2x1xf32>
    %196 = vector.broadcast %195 : vector<2x1xf32> to vector<2x32xf32>
    %197 = arith.mulf %192, %196 : vector<2x32xf32>
    %198 = vector.broadcast %178 : vector<1x32xf32> to vector<2x32xf32>
    %199 = arith.mulf %197, %198 : vector<2x32xf32>
    %200 = vector.broadcast %179 : vector<1x32xf32> to vector<2x32xf32>
    %201 = arith.addf %199, %200 : vector<2x32xf32>
    %202 = arith.truncf %201 : vector<2x32xf32> to vector<2x32xbf16>
    %c0_87 = arith.constant 0 : index
    %c0_88 = arith.constant 0 : index
    %203 = vector.load %arg13[%c0_87, %c0_88] : memref<32x64xbf16, #tpu.memory_space<vmem>>, vector<32x64xbf16>
    %cst_89 = arith.constant dense<0.000000e+00> : vector<2x64xf32>
    %204 = tpu.matmul %202, %203, %cst_89 {dimension_numbers = #tpu.dot_dimension_numbers<[1], [0], [0], [1], [0, 0, 1, 1], [], []>} : vector<2x32xbf16>, vector<32x64xbf16>, vector<2x64xf32> -> vector<2x64xf32>
    %c0_90 = arith.constant 0 : index
    %c0_91 = arith.constant 0 : index
    %205 = vector.load %arg14[%c0_90, %c0_91] : memref<1x64xf32, #tpu.memory_space<vmem>>, vector<1x64xf32>
    %206 = vector.broadcast %205 : vector<1x64xf32> to vector<2x64xf32>
    %207 = arith.addf %204, %206 : vector<2x64xf32>
    %cst_92 = arith.constant 0.000000e+00 : f32
    %208 = vector.broadcast %cst_92 : f32 to vector<2x64xf32>
    %209 = arith.maximumf %207, %208 : vector<2x64xf32>
    %210 = arith.truncf %209 : vector<2x64xf32> to vector<2x64xbf16>
    %c0_93 = arith.constant 0 : index
    %c0_94 = arith.constant 0 : index
    %211 = vector.load %arg15[%c0_93, %c0_94] : memref<64x32xbf16, #tpu.memory_space<vmem>>, vector<64x32xbf16>
    %cst_95 = arith.constant dense<0.000000e+00> : vector<2x32xf32>
    %212 = tpu.matmul %210, %211, %cst_95 {dimension_numbers = #tpu.dot_dimension_numbers<[1], [0], [0], [1], [0, 0, 1, 1], [], []>} : vector<2x64xbf16>, vector<64x32xbf16>, vector<2x32xf32> -> vector<2x32xf32>
    %c0_96 = arith.constant 0 : index
    %c0_97 = arith.constant 0 : index
    %213 = vector.load %arg16[%c0_96, %c0_97] : memref<1x32xf32, #tpu.memory_space<vmem>>, vector<1x32xf32>
    %214 = vector.broadcast %213 : vector<1x32xf32> to vector<2x32xf32>
    %215 = arith.addf %212, %214 : vector<2x32xf32>
    %216 = arith.addf %201, %215 : vector<2x32xf32>
    %c0_98 = arith.constant 0 : index
    %c0_99 = arith.constant 0 : index
    %217 = vector.load %arg17[%c0_98, %c0_99] : memref<1x32xf32, #tpu.memory_space<vmem>>, vector<1x32xf32>
    %c0_100 = arith.constant 0 : index
    %c0_101 = arith.constant 0 : index
    %218 = vector.load %arg18[%c0_100, %c0_101] : memref<1x32xf32, #tpu.memory_space<vmem>>, vector<1x32xf32>
    %cst_102 = arith.constant dense<0.000000e+00> : vector<2xf32>
    %219 = vector.multi_reduction <add>, %216, %cst_102 [1] : vector<2x32xf32> to vector<2xf32>
    %220 = vector.shape_cast %219 : vector<2xf32> to vector<2x1xf32>
    %cst_103 = arith.constant 3.200000e+01 : f32
    %221 = vector.broadcast %cst_103 : f32 to vector<2x1xf32>
    %222 = arith.divf %220, %221 : vector<2x1xf32>
    %223 = vector.broadcast %222 : vector<2x1xf32> to vector<2x32xf32>
    %224 = arith.subf %216, %223 : vector<2x32xf32>
    %225 = arith.mulf %224, %224 : vector<2x32xf32>
    %cst_104 = arith.constant dense<0.000000e+00> : vector<2xf32>
    %226 = vector.multi_reduction <add>, %225, %cst_104 [1] : vector<2x32xf32> to vector<2xf32>
    %227 = vector.shape_cast %226 : vector<2xf32> to vector<2x1xf32>
    %cst_105 = arith.constant 3.200000e+01 : f32
    %228 = vector.broadcast %cst_105 : f32 to vector<2x1xf32>
    %229 = arith.divf %227, %228 : vector<2x1xf32>
    %230 = vector.broadcast %222 : vector<2x1xf32> to vector<2x32xf32>
    %231 = arith.subf %216, %230 : vector<2x32xf32>
    %cst_106 = arith.constant 9.99999974E-6 : f32
    %232 = vector.broadcast %cst_106 : f32 to vector<2x1xf32>
    %233 = arith.addf %229, %232 : vector<2x1xf32>
    %234 = math.rsqrt %233 : vector<2x1xf32>
    %235 = vector.broadcast %234 : vector<2x1xf32> to vector<2x32xf32>
    %236 = arith.mulf %231, %235 : vector<2x32xf32>
    %237 = vector.broadcast %217 : vector<1x32xf32> to vector<2x32xf32>
    %238 = arith.mulf %236, %237 : vector<2x32xf32>
    %239 = vector.broadcast %218 : vector<1x32xf32> to vector<2x32xf32>
    %240 = arith.addf %238, %239 : vector<2x32xf32>
    %c0_107 = arith.constant 0 : index
    %c0_108 = arith.constant 0 : index
    %241 = vector.load %arg21[%c0_107, %c0_108] : memref<2x32xf32, #tpu.memory_space<vmem>>, vector<2x32xf32>
    tpu.vector_store %arg21[%c0_107, %c0_108], %240 {strides = array<i32>} : memref<2x32xf32, #tpu.memory_space<vmem>>, vector<2x32xf32>,
    %242 = arith.truncf %240 : vector<2x32xf32> to vector<2x32xbf16>
    %c0_109 = arith.constant 0 : index
    %c0_110 = arith.constant 0 : index
    %243 = vector.load %arg19[%c0_109, %c0_110] : memref<32x5xbf16, #tpu.memory_space<vmem>>, vector<32x5xbf16>
    %cst_111 = arith.constant dense<0.000000e+00> : vector<2x5xf32>
    %244 = tpu.matmul %242, %243, %cst_111 {dimension_numbers = #tpu.dot_dimension_numbers<[1], [0], [0], [1], [0, 0, 1, 1], [], []>} : vector<2x32xbf16>, vector<32x5xbf16>, vector<2x5xf32> -> vector<2x5xf32>
    %c0_112 = arith.constant 0 : index
    %c0_113 = arith.constant 0 : index
    %245 = vector.load %arg20[%c0_112, %c0_113] : memref<1x5xf32, #tpu.memory_space<vmem>>, vector<1x5xf32>
    %246 = vector.broadcast %245 : vector<1x5xf32> to vector<2x5xf32>
    %247 = arith.addf %244, %246 : vector<2x5xf32>
    %c0_114 = arith.constant 0 : index
    %c0_115 = arith.constant 0 : index
    %248 = vector.load %arg22[%c0_114, %c0_115] : memref<2x5xf32, #tpu.memory_space<vmem>>, vector<2x5xf32>
    tpu.vector_store %arg22[%c0_114, %c0_115], %247 {strides = array<i32>} : memref<2x5xf32, #tpu.memory_space<vmem>>, vector<2x5xf32>,
    return
  }
}

</mosaic_0001>

<bundles_post_ra>
// kernel: tpu_custom_call.1
= control target key start
LH: loop header
LB: loop body
LE: loop exit
PB: predicated region body
PF: predicated region fallthrough
CT: control target
= control target key end

     0   :  { %s1915_s0 = inlined_call_operand.hbm [shape: f32[2,64], index: 0, kind: input, shape index: {}]   ;;  %s1916_s1 = inlined_call_operand.hbm [shape: bf16[64,256], index: 1, kind: input, shape index: {}]   ;;  %s1917_s2 = inlined_call_operand.hbm [shape: f32[1,256], index: 2, kind: input, shape index: {}]   ;;  %s1918_s3 = inlined_call_operand.vmem [shape: bf16[256,128], index: 3, kind: input, shape index: {}]   ;;  %s1919_s4 = inlined_call_operand.hbm [shape: f32[1,128], index: 4, kind: input, shape index: {}]   ;;  %s1920_s5 = inlined_call_operand.vmem [shape: bf16[128,64], index: 5, kind: input, shape index: {}]   ;;  %s1921_s6 = inlined_call_operand.hbm [shape: f32[1,64], index: 6, kind: input, shape index: {}]   ;;  %s1922_s7 = inlined_call_operand.hbm [shape: f32[1,32], index: 7, kind: input, shape index: {}]   ;;  %s1923_s8 = inlined_call_operand.hbm [shape: bf16[32,32], index: 8, kind: input, shape index: {}]   ;;  %s1924_s9 = inlined_call_operand.hbm [shape: f32[1,32], index: 9, kind: input, shape index: {}]   ;;  %s1925_s10 = inlined_call_operand.vmem [shape: f32[1,32], index: 10, kind: input, shape index: {}]   ;;  %s1926_s11 = inlined_call_operand.vmem [shape: f32[1,32], index: 11, kind: input, shape index: {}]   ;;  %s1927_s12 = inlined_call_operand.vmem [shape: f32[1,32], index: 12, kind: input, shape index: {}]   ;;  %s1928_s13 = inlined_call_operand.hbm [shape: bf16[32,64], index: 13, kind: input, shape index: {}]   ;;  %s1929_s14 = inlined_call_operand.vmem [shape: f32[1,64], index: 14, kind: input, shape index: {}]   ;;  %s1930_s15 = inlined_call_operand.vmem [shape: bf16[64,32], index: 15, kind: input, shape index: {}]   ;;  %s1931_s16 = inlined_call_operand.vmem [shape: f32[1,32], index: 16, kind: input, shape index: {}]   ;;  %s1932_s17 = inlined_call_operand.vmem [shape: f32[1,32], index: 17, kind: input, shape index: {}]   ;;  %s1933_s18 = inlined_call_operand.vmem [shape: f32[1,32], index: 18, kind: input, shape index: {}]   ;;  %s1934_s19 = inlined_call_operand.vmem [shape: bf16[32,5], index: 19, kind: input, shape index: {}]   ;;  %s1935_s20 = inlined_call_operand.vmem [shape: f32[1,5], index: 20, kind: input, shape index: {}]   ;;  %s1936_s21 = inlined_call_operand.hbm [shape: f32[2,32], index: 21, kind: output, shape index: {0}]   ;;  %s1937_s22 = inlined_call_operand.hbm [shape: f32[2,5], index: 22, kind: output, shape index: {1}]  }
   0x1   :  { %1940 = sst [smem:[#allocation27_spill]] %s1915_s0 }
   0x2   :  { %1941 = sst [smem:[#allocation28_spill]] %s1916_s1 }
   0x3   :  { %1942 = sst [smem:[#allocation29_spill]] %s1917_s2 }
   0x4   :  { %1943 = sst [smem:[#allocation30_spill]] %s1918_s3 }
   0x5   :  { %1944 = sst [smem:[#allocation31_spill]] %s1919_s4 }
   0x6   :  { %1945 = sst [smem:[#allocation32_spill]] %s1920_s5 }
   0x7   :  { %1946 = sst [smem:[#allocation33_spill]] %s1921_s6 }
   0x8   :  { %28 = vsyncpa [#allocation3], 0 }
   0x9   :  { %29 = vsyncpa [#allocation6], 0 }
   0xa   :  { %30 = vsyncpa [#allocation9], 0 }
   0xb   :  { %31 = vsyncpa [#allocation12], 0 }
   0xc   :  { %32 = vsyncpa [#allocation15], 0 }
   0xd   :  { %33 = vsyncpa [#allocation4], 0 }
   0xe   :  { %34 = vsyncpa [#allocation19], 0  ;;  %s1589_s3 = smov [#allocation5]  }
   0xf   :  { %s50_s28 = sshll.u32 %s1589_s3, 4  ;;  %s51_s28 = int_to_ptr.vmem [resolvable:$true] %s50_s28 }
  0x10   :  { %s1363_s29 = scalar_lea.vmem %s51_s28, 1024  ;;  %p1368_p1 = scmp.lt.s32.totalorder %s51_s28, %s51_s28 }
  0x11   :  { %p1364_p0 = scmp.ne.s32.totalorder %s51_s28, %s1363_s29  ;;  %p1369_p2 = scmp.lt.s32.totalorder %s1363_s29, %s1363_s29 }
  0x13   :  { %p1370_p3 = por %p1369_p2, %p1368_p1 }
  0x15   :  { %p1371_p4 = pnand %p1370_p3, %p1364_p0 }
  0x17   :  { %1374 = shalt.err (!%p1371_p4)
}
  0x18   :  { %s1590_s30 = smov 128   ;;  %s1591_s4 = smov 8  }
  0x19   :  { %s1947_s1 = sld [smem:[#allocation28_spill]]  ;;  %s1592_s5 = smov [#allocation8]  }
  0x1a   :  { %s75_s24 = sshll.u32 %s1592_s5, 4  ;;  %s1593_s6 = smov [#allocation11]   ;;  %s76_s24 = int_to_ptr.vmem [resolvable:$true] %s75_s24 }
  0x1b   :  { %s97_s25 = sshll.u32 %s1593_s6, 4  ;;  %s1383_s26 = scalar_lea.vmem %s76_s24, 16  ;;  %s98_s25 = int_to_ptr.vmem [resolvable:$true] %s97_s25 }
  0x1c   :  { %p1384_p5 = scmp.ne.s32.totalorder %s76_s24, %s1383_s26  ;;  %s1387_s2 = scalar_lea.vmem %s76_s24, 32 }
  0x1d   :  { %p1388_p6 = scmp.lt.s32.totalorder %s76_s24, %s76_s24  ;;  %p1389_p7 = scmp.lt.s32.totalorder %s1387_s2, %s1383_s26 }
  0x1f   :  { %56 = dma.hbm_to_vmem [thread:$0]  %s1947_s1, 1024, %s51_s28, [#allocation6], %s1590_s30, %s1590_s30, %s1591_s4  }
  0x20   :  { %p1390_p8 = por %p1389_p7, %p1388_p6 }
  0x22   :  { %p1391_p9 = pnand %p1390_p8, %p1384_p5 }
  0x24   :  { %1394 = shalt.err (!%p1391_p9)
}
  0x25   :  { %s1948_s29 = sld [smem:[#allocation31_spill]]  ;;  %s1403_s0 = scalar_lea.vmem %s98_s25, 16 }
  0x26   :  { %p1404_p10 = scmp.ne.s32.totalorder %s98_s25, %s1403_s0  ;;  %s1407_s28 = scalar_lea.vmem %s98_s25, 32 }
  0x27   :  { %p1408_p11 = scmp.lt.s32.totalorder %s98_s25, %s98_s25  ;;  %p1409_p12 = scmp.lt.s32.totalorder %s1407_s28, %s1403_s0 }
  0x29   :  { %p1410_p13 = por %p1409_p12, %p1408_p11 }
  0x2b   :  { %78 = dma.hbm_to_vmem [thread:$0]  %s1948_s29, 16, %s76_s24, [#allocation9]  }
  0x2c   :  { %p1411_p0 = pnand %p1410_p13, %p1404_p10 }
  0x2e   :  { %1414 = shalt.err (!%p1411_p0)
}
  0x2f   :  { %100 = dma.hbm_to_vmem [thread:$0]  %s1922_s7, 16, %s98_s25, [#allocation12]  }
  0x30   :  { %s1594_s23 = smov [#allocation14]   ;;  %s1595_s5 = smov [#allocation2]  }
  0x31   :  { %s119_s1 = sshll.u32 %s1594_s23, 4  ;;  %s41_s6 = sshll.u32 %s1595_s5, 4  ;;  %s120_s1 = int_to_ptr.vmem [resolvable:$true] %s119_s1  ;;  %s42_s6 = int_to_ptr.vmem [resolvable:$true] %s41_s6 }
  0x32   :  { %s1423_s26 = scalar_lea.vmem %s120_s1, 16  ;;  %s1427_s24 = scalar_lea.vmem %s120_s1, 32 }
  0x33   :  { %p1424_p1 = scmp.ne.s32.totalorder %s120_s1, %s1423_s26  ;;  %p1428_p2 = scmp.lt.s32.totalorder %s120_s1, %s120_s1 }
  0x34   :  { %p1429_p3 = scmp.lt.s32.totalorder %s1427_s24, %s1423_s26 }
  0x36   :  { %p1430_p4 = por %p1429_p3, %p1428_p2 }
  0x38   :  { %p1431_p5 = pnand %p1430_p4, %p1424_p1 }
  0x3a   :  { %1434 = shalt.err (!%p1431_p5)
}
  0x3b   :  { %122 = dma.hbm_to_vmem [thread:$0]  %s1924_s9, 16, %s120_s1, [#allocation15]  }
  0x3c   :  { %s1443_s3 = scalar_lea.vmem %s42_s6, 32  ;;  %p1448_p7 = scmp.lt.s32.totalorder %s42_s6, %s42_s6 }
  0x3d   :  { %p1444_p6 = scmp.ne.s32.totalorder %s42_s6, %s1443_s3  ;;  %p1449_p8 = scmp.lt.s32.totalorder %s1443_s3, %s1443_s3 }
  0x3f   :  { %p1450_p9 = por %p1449_p8, %p1448_p7 }
  0x41   :  { %p1451_p10 = pnand %p1450_p9, %p1444_p6 }
  0x43   :  { %1454 = shalt.err (!%p1451_p10)
}
  0x44   :  { %s1949_s29 = sld [smem:[#allocation27_spill]]  ;;  %s1596_s0 = smov [#allocation7]  }
  0x45   :  { %s63_s28 = sshll.u32 %s1596_s0, 4  ;;  %s1597_s30 = smov [#allocation10]   ;;  %s64_s28 = int_to_ptr.vmem [resolvable:$true] %s63_s28 }
  0x46   :  { %s87_s4 = sshll.u32 %s1597_s30, 4  ;;  %s1463_s23 = scalar_lea.vmem %s64_s28, 32  ;;  %s88_s4 = int_to_ptr.vmem [resolvable:$true] %s87_s4 }
  0x47   :  { %p1464_p11 = scmp.ne.s32.totalorder %s64_s28, %s1463_s23  ;;  %p1468_p12 = scmp.lt.s32.totalorder %s64_s28, %s64_s28 }
  0x48   :  { %p1469_p13 = scmp.lt.s32.totalorder %s1463_s23, %s1463_s23 }
  0x4a   :  { %44 = dma.hbm_to_vmem [thread:$0]  %s1949_s29, 32, %s42_s6, [#allocation3]  }
  0x4b   :  { %p1470_p0 = por %p1469_p13, %p1468_p12 }
  0x4d   :  { %p1471_p1 = pnand %p1470_p0, %p1464_p11 }
  0x4f   :  { %1474 = shalt.err (!%p1471_p1)
}
  0x50   :  { %s1950_s5 = sld [smem:[#allocation29_spill]]  ;;  %s1483_s26 = scalar_lea.vmem %s88_s4, 16 }
  0x51   :  { %p1484_p2 = scmp.ne.s32.totalorder %s88_s4, %s1483_s26  ;;  %s1487_s6 = scalar_lea.vmem %s88_s4, 32 }
  0x52   :  { %p1488_p3 = scmp.lt.s32.totalorder %s88_s4, %s88_s4  ;;  %p1489_p4 = scmp.lt.s32.totalorder %s1487_s6, %s1483_s26 }
  0x54   :  { %p1490_p5 = por %p1489_p4, %p1488_p3 }
  0x56   :  { %66 = dma.hbm_to_vmem [thread:$0]  %s1950_s5, 32, %s64_s28, [#allocation6]  }
  0x57   :  { %p1491_p6 = pnand %p1490_p5, %p1484_p2 }
  0x59   :  { %1494 = shalt.err (!%p1491_p6)
}
  0x5a   :  { %s1951_s27 = sld [smem:[#allocation33_spill]]  ;;  %s1598_s3 = smov [#allocation13]  }
  0x5b   :  { %s106_s7 = sshll.u32 %s1598_s3, 4  ;;  %s107_s7 = int_to_ptr.vmem [resolvable:$true] %s106_s7 }
  0x5c   :  { %s1503_s25 = scalar_lea.vmem %s107_s7, 256  ;;  %p1508_p8 = scmp.lt.s32.totalorder %s107_s7, %s107_s7 }
  0x5d   :  { %p1504_p7 = scmp.ne.s32.totalorder %s107_s7, %s1503_s25  ;;  %p1509_p9 = scmp.lt.s32.totalorder %s1503_s25, %s1503_s25 }
  0x5f   :  { %p1510_p10 = por %p1509_p9, %p1508_p8 }
  0x60   :  { %90 = dma.hbm_to_vmem [thread:$0]  %s1951_s27, 16, %s88_s4, [#allocation9]  }
  0x61   :  { %p1511_p11 = pnand %p1510_p10, %p1504_p7 }
  0x63   :  { %1514 = shalt.err (!%p1511_p11)
}
  0x64   :  { %s1599_s29 = smov 64   ;;  %s1600_s0 = smov 4  }
  0x65   :  { %112 = dma.hbm_to_vmem [thread:$0]  %s1923_s8, 256, %s107_s7, [#allocation12], %s1599_s29, %s1599_s29, %s1600_s0  }
  0x66   :  { %s1601_s23 = smov [#allocation16]  }
  0x67   :  { %s134_s9 = sshll.u32 %s1601_s23, 4  ;;  %s135_s9 = int_to_ptr.vmem [resolvable:$true] %s134_s9 }
  0x68   :  { %s1523_s4 = scalar_lea.vmem %s135_s9, 256  ;;  %p1528_p13 = scmp.lt.s32.totalorder %s135_s9, %s135_s9 }
  0x69   :  { %p1524_p12 = scmp.ne.s32.totalorder %s135_s9, %s1523_s4  ;;  %p1529_p0 = scmp.lt.s32.totalorder %s1523_s4, %s1523_s4 }
  0x6b   :  { %p1530_p1 = por %p1529_p0, %p1528_p13 }
  0x6d   :  { %p1531_p2 = pnand %p1530_p1, %p1524_p12 }
  0x6f   :  { %1534 = shalt.err (!%p1531_p2)
}
  0x70   :  { %140 = dma.hbm_to_vmem [thread:$0]  %s1928_s13, 256, %s135_s9, [#allocation15], %s1599_s29, %s1599_s29, %s1600_s0  }
  0x71   :  { %1575 = dma.done.wait [#allocation3], 32  }
  0x72   :  { %1576 = vsyncadd [#allocation3], 4294967264 }
  0x73   :  { %1577 = dma.done.wait [#allocation6], 1056  }
  0x74   :  { %1578 = vsyncadd [#allocation6], 4294966240 }
  0x75   :  { %1579 = dma.done.wait [#allocation9], 32  }
  0x76   :  { %1580 = vsyncadd [#allocation9], 4294967264 }
  0x77   :  { %1581 = dma.done.wait [#allocation12], 272  }
  0x78   :  { %1582 = vsyncadd [#allocation12], 4294967024 }
  0x79   :  { %1583 = dma.done.wait [#allocation15], 272  }
  0x7a   :  { %1584 = vsyncadd [#allocation15], 4294967024  ;;  %v1602_v0 = vmov 0   ;;  %v1287_v1 = vld [vmem:[#allocation5 + $0x34] ss:$8 sps:$4 sm:$0xff]   ;;  %vm245_vm0 = vcmask 523264   ;;  %v195_v27 = vlaneseq }
  0x7b   :  { %281 = vmatprep.mubr.bf16.mxu0 %v1602_v0  ;;  %v1289_v2 = vld [vmem:[#allocation5 + $0x30] ss:$8 sps:$4 sm:$0xff]   ;;  %257 = vmatprep.subr.bf16.mxu0 %v1287_v1  ;;  %v1290_v3 = vld [vmem:[#allocation5 + $0x24] ss:$8 sps:$4 sm:$0xff]   ;;  %v1292_v4 = vld [vmem:[#allocation5 + $0x20] ss:$8 sps:$4 sm:$0xff]  }
  0x7c   :  { %258 = vmatpush1.bf16.msra.mxu0 %v1289_v2  ;;  %v1293_v5 = vld [vmem:[#allocation5 + $0x14] ss:$8 sps:$4 sm:$0xff]   ;;  %v1295_v6 = vld [vmem:[#allocation5 + $0x10] ss:$8 sps:$4 sm:$0xff]   ;;  %v1296_v7 = vld [vmem:[#allocation5 + $0x4] ss:$8 sps:$4 sm:$0xff]  }
  0x7d   :  { %259 = vmatprep.subr.bf16.mxu0 %v1290_v3  ;;  %v1298_v8 = vld [vmem:[#allocation5] ss:$8 sps:$4 sm:$0xff]   ;;  %v183_v9 = vld [vmem:[#allocation2] sm:$0x3]  ;;  %s1952_s26 = sld [smem:[#allocation30_spill]]  ;;  %v196_v28 = vshrl.u32 %v195_v27, 7 }
  0x7e   :  { %v184_v10 = vpack.c.bf16 %v183_v9, %v183_v9  ;;  %v193_v30 = vld [vmem:[#allocation7] sm:$0x3]  ;;  %s1953_s4 = sld [smem:[#allocation32_spill]]  ;;  %vm1605_vm3 = vmmov 0   ;;  %s1606_s30 = smov 96   ;;  %vm710_vm6 = vcmask 261120  }
  0x7f   :  { %v197_v29 = vsub.s32 0, %v196_v28  ;;  %v201_v31 = vsub.s32 1, %v196_v28  ;;  %vm764_vm7 = vcmask 254976  }
  0x80   :  { %260 = vmatpush1.bf16.msra.mxu0 %v1292_v4 }
  0x81   :  { %261 = vmatprep.subr.bf16.mxu0 %v1293_v5  ;;  %v198_v32 = vrot.slane %v193_v30, %v197_v29  ;;  %v202_v33 = vrot.slane %v193_v30, %v201_v31  ;;  %v1604_v30 = vmov 0.0  }
  0x83   :  { %v1299_v11 = vld [vmem:[%s1952_s26 + $0x78] sm:$0xff]   ;;  %v1301_v13 = vld [vmem:[%s1952_s26 + $0x70] sm:$0xff]   ;;  %v1303_v15 = vld [vmem:[%s1952_s26 + $0x68] sm:$0xff]  }
  0x84   :  { %262 = vmatpush1.bf16.msra.mxu0 %v1295_v6  ;;  %v1300_v12 = vld [vmem:[%s1952_s26 + $0x38] sm:$0xff]   ;;  %1166 = vmatprep.subr.bf16.mxu1 %v1299_v11  ;;  %v1302_v14 = vld [vmem:[%s1952_s26 + $0x30] sm:$0xff]   ;;  %v1304_v16 = vld [vmem:[%s1952_s26 + $0x28] sm:$0xff]  }
  0x85   :  { %263 = vmatprep.subr.bf16.mxu0 %v1296_v7  ;;  %1167 = vmatpush3.bf16.msra.mxu1 %v1300_v12  ;;  %v1305_v17 = vld [vmem:[%s1952_s26 + $0x60] sm:$0xff]   ;;  %v1307_v19 = vld [vmem:[%s1952_s26 + $0x58] sm:$0xff]   ;;  %v1309_v21 = vld [vmem:[%s1952_s26 + $0x50] sm:$0xff]  }
  0x86   :  { %1168 = vmatprep.subr.bf16.mxu1 %v1301_v13  ;;  %v1306_v18 = vld [vmem:[%s1952_s26 + $0x20] sm:$0xff]   ;;  %v1308_v20 = vld [vmem:[%s1952_s26 + $0x18] sm:$0xff]   ;;  %v1310_v22 = vld [vmem:[%s1952_s26 + $0x10] sm:$0xff]  }
  0x87   :  { %v1311_v23 = vld [vmem:[%s1952_s26 + $0x48] sm:$0xff]   ;;  %v1313_v25 = vld [vmem:[%s1952_s26 + $0x40] sm:$0xff]   ;;  %v1315_v29 = vld [vmem:[%s1953_s4 + $0x38] sm:$0xff]  }
  0x88   :  { %264 = vmatpush1.bf16.msra.mxu0 %v1298_v8  ;;  %v1312_v24 = vld [vmem:[%s1952_s26 + $0x8] sm:$0xff]   ;;  %v1314_v26 = vld [vmem:[%s1952_s26] sm:$0xff]   ;;  %v1316_v31 = vld [vmem:[%s1953_s4 + $0x30] sm:$0xff]  }
  0x89   :  { %1169 = vmatpush3.bf16.msra.mxu1 %v1302_v14  ;;  %v1603_v14 = vmov -1.0   ;;  %1211 = vmatprep.subr.bf16.mxu0 %v1604_v30 }
  0x8a   :  { %1170 = vmatprep.subr.bf16.mxu1 %v1303_v15 }
  0x8b   :  { %1115 = vmatmul.mubr.msk.bf16.vlgmr.msra.gmra.mxu0 %vm245_vm0, %v184_v10 }
  0x8c   :  { %1212 = vmatpush3.bf16.msra.mxu0 %v1315_v29  ;;  %1227 = vmatprep.mubr.msk.bf16.mxu0 %vm1605_vm3, %v1604_v30 }
  0x8d   :  { %1171 = vmatpush3.bf16.msra.mxu1 %v1304_v16  ;;  %1213 = vmatprep.subr.bf16.mxu0 %v1604_v30 }
  0x8e   :  { %1172 = vmatprep.subr.bf16.mxu1 %v1305_v17 }
  0x90   :  { %1214 = vmatpush3.bf16.msra.mxu0 %v1316_v31 }
  0x91   :  { %1173 = vmatpush3.bf16.msra.mxu1 %v1306_v18  ;;  %1215 = vmatprep.subr.bf16.mxu0 %v1604_v30 }
  0x92   :  { %1174 = vmatprep.subr.bf16.mxu1 %v1307_v19 }
  0x95   :  { %1175 = vmatpush3.bf16.msra.mxu1 %v1308_v20 }
  0x96   :  { %1176 = vmatprep.subr.bf16.mxu1 %v1309_v21 }
  0x99   :  { %1177 = vmatpush3.bf16.msra.mxu1 %v1310_v22 }
  0x9a   :  { %1178 = vmatprep.subr.bf16.mxu1 %v1311_v23 }
  0x9d   :  { %1179 = vmatpush3.bf16.msra.mxu1 %v1312_v24 }
  0x9e   :  { %1180 = vmatprep.subr.bf16.mxu1 %v1313_v25 }
  0xa1   :  { %1181 = vmatpush3.bf16.msra.mxu1 %v1314_v26 }
  0xa2   :  { %1231 = vmatprep.subr.bf16.mxu1 %v1604_v30 }
 0x14b   :  { %v283_v34 = vpop.f32.mrf.mxu0 }
 0x14c   :  { %v284_v35 = vadd.f32 %v283_v34, %v198_v32  ;;  %v1317_v32 = vld [vmem:[%s1953_s4 + $0x28] sm:$0xff]   ;;  %v1319_v34 = vld [vmem:[%s1953_s4 + $0x18] sm:$0xff]  }
 0x14d   :  { %v285_v36 = vpop.f32.mrf.mxu0  ;;  %1216 = vmatpush3.bf16.msra.mxu0 %v1317_v32 }
 0x14e   :  { %v292_v37 = vmul.f32 0.70710677, %v284_v35  ;;  %v286_v38 = vadd.f32 %v285_v36, %v202_v33  ;;  %v290_v22 = vmul.f32 0.5, %v284_v35  ;;  %1217 = vmatprep.subr.bf16.mxu0 %v1604_v30  ;;  %v1318_v33 = vld [vmem:[%s1953_s4 + $0x20] sm:$0xff]   ;;  %v1320_v35 = vld [vmem:[%s1953_s4 + $0x10] sm:$0xff]   ;;  %v1321_v36 = vld [vmem:[%s1953_s4 + $0x8] sm:$0xff]  }
 0x14f   :  { %v287_v39 = vpop.f32.mrf.mxu0 }
 0x150   :  { %v298_v40 = vand.u32 2147483647, %v292_v37  ;;  %v293_v41 = vmul.f32 0.70710677, %v286_v38  ;;  %vm294_vm1 = vcmp.ge.f32.partialorder %v292_v37, 0.0  ;;  %v291_v23 = vmul.f32 0.5, %v286_v38 }
 0x151   :  { %v288_v42 = vpop.f32.mrf.mxu0  ;;  %v296_v15 = vsel %vm294_vm1, 1.0, %v1603_v14  ;;  %1218 = vmatpush3.bf16.msra.mxu0 %v1318_v33  ;;  %v1322_v37 = vld [vmem:[%s1953_s4] sm:$0xff]   ;;  %v1324_v33 = vld [vmem:[#allocation13] sm:$0xff]  }
 0x152   :  { %v300_v43 = vmul.f32 0.3275911, %v298_v40  ;;  %v299_v44 = vand.u32 2147483647, %v293_v41  ;;  %v326_v48 = vsub.f32 0.0, %v298_v40  ;;  %vm295_vm2 = vcmp.ge.f32.partialorder %v293_v41, 0.0  ;;  %1219 = vmatprep.subr.bf16.mxu0 %v1604_v30 }
 0x153   :  { %v297_v19 = vsel %vm295_vm2, 1.0, %v1603_v14  ;;  %v1116_v39 = vld [vmem:[#allocation8] ss:$0 sm:$0xff] }
 0x154   :  { %v302_v45 = vadd.f32 1.0, %v300_v43  ;;  %v301_v46 = vmul.f32 0.3275911, %v299_v44  ;;  %v327_v49 = vsub.f32 0.0, %v299_v44  ;;  %v328_v50 = vmul.f32 %v326_v48, %v298_v40 }
 0x155   :  { %1220 = vmatpush3.bf16.msra.mxu0 %v1319_v34 }
 0x156   :  { %1333 = vrcp.f32 %v302_v45  ;;  %v303_v47 = vadd.f32 1.0, %v301_v46  ;;  %v329_v52 = vmul.f32 %v327_v49, %v299_v44  ;;  %v330_v54 = vmul.f32 1.442695, %v328_v50  ;;  %1221 = vmatprep.subr.bf16.mxu0 %v1604_v30 }
 0x158   :  { %1335 = vrcp.f32 %v303_v47  ;;  %v332_v57 = vmul.f32 1.442695, %v329_v52 }
 0x159   :  { %1337 = vpow2.f32 %v330_v54  ;;  %1222 = vmatpush3.bf16.msra.mxu0 %v1320_v35 }
 0x15a   :  { %1339 = vpow2.f32 %v332_v57  ;;  %1223 = vmatprep.subr.bf16.mxu0 %v1604_v30 }
 0x15d   :  { %1224 = vmatpush3.bf16.msra.mxu0 %v1321_v36 }
 0x15e   :  { %1225 = vmatprep.subr.bf16.mxu0 %v1604_v30 }
 0x161   :  { %1226 = vmatpush3.bf16.msra.mxu0 %v1322_v37 }
 0x162   :  { %1247 = vmatprep.subr.bf16.mxu0 %v1604_v30 }
 0x163   :  { %v1334_v51 = vpop.eup %1333 }
 0x164   :  { %v308_v53 = vmul.f32 1.0614054, %v1334_v51 }
 0x165   :  { %v1336_v55 = vpop.eup %1335 }
 0x166   :  { %v310_v56 = vadd.f32 -1.4531521, %v308_v53  ;;  %v309_v58 = vmul.f32 1.0614054, %v1336_v55  ;;  %v1338_v8 = vpop.eup %1337 }
 0x167   :  { %v1340_v12 = vpop.eup %1339 }
 0x168   :  { %v312_v59 = vmul.f32 %v1334_v51, %v310_v56  ;;  %v311_v60 = vadd.f32 -1.4531521, %v309_v58 }
 0x16a   :  { %v314_v61 = vadd.f32 1.4214138, %v312_v59  ;;  %v313_v62 = vmul.f32 %v1336_v55, %v311_v60 }
 0x16c   :  { %v316_v63 = vmul.f32 %v1334_v51, %v314_v61  ;;  %v315_v0 = vadd.f32 1.4214138, %v313_v62 }
 0x16e   :  { %v318_v1 = vadd.f32 -0.28449672, %v316_v63  ;;  %v317_v2 = vmul.f32 %v1336_v55, %v315_v0 }
 0x170   :  { %v320_v3 = vmul.f32 %v1334_v51, %v318_v1  ;;  %v319_v4 = vadd.f32 -0.28449672, %v317_v2 }
 0x172   :  { %v322_v5 = vadd.f32 0.2548296, %v320_v3  ;;  %v321_v6 = vmul.f32 %v1336_v55, %v319_v4 }
 0x174   :  { %v324_v7 = vmul.f32 %v1334_v51, %v322_v5  ;;  %v323_v9 = vadd.f32 0.2548296, %v321_v6 }
 0x176   :  { %v334_v10 = vmul.f32 %v1338_v8, %v324_v7  ;;  %v325_v11 = vmul.f32 %v1336_v55, %v323_v9  ;;  %v1323_v7 = vld [vmem:[#allocation13 + $0x8] sm:$0xff]   ;;  %v1133_v8 = vld [vmem:[#allocation10] ss:$0 sm:$0xff] }
 0x178   :  { %v336_v13 = vsub.f32 1.0, %v334_v10  ;;  %v335_v16 = vmul.f32 %v1340_v12, %v325_v11 }
 0x17a   :  { %v338_v17 = vmul.f32 %v336_v13, %v296_v15  ;;  %v337_v18 = vsub.f32 1.0, %v335_v16 }
 0x17c   :  { %v340_v20 = vadd.f32 1.0, %v338_v17  ;;  %v339_v21 = vmul.f32 %v337_v18, %v297_v19 }
 0x17e   :  { %v341_v24 = vadd.f32 1.0, %v339_v21  ;;  %v342_v25 = vmul.f32 %v340_v20, %v290_v22 }
 0x180   :  { %v343_v26 = vmul.f32 %v341_v24, %v291_v23  ;;  %v344_v28 = vpack.c.bf16 %v342_v25, %v342_v25 }
 0x182   :  { %v345_v27 = vpack.c.bf16 %v343_v26, %v343_v26 }
 0x184   :  { %513 = vmatprep.mubr.bf16.mxu1 %v345_v27 }
 0x185   :  { %514 = vmatmul.mubr.bf16.vlgmr.msra.gmra.mxu1 %v344_v28 }
 0x186   :  { %1235 = vmatprep.mubr.msk.bf16.mxu1 %vm1605_vm3, %v1604_v30  ;;  %1232 = vmatpush3.bf16.msra.mxu1 %v1323_v7 }
 0x187   :  { %1233 = vmatprep.subr.bf16.mxu1 %v1604_v30 }
 0x18a   :  { %1234 = vmatpush3.bf16.msra.mxu1 %v1324_v33 }
 0x18b   :  { %1239 = vmatprep.subr.bf16.mxu1 %v1604_v30 }
 0x245   :  { %v1182_v38 = vpop.f32.mrf.mxu1 }
 0x247   :  { %v1183_v40 = vpop.f32.mrf.mxu1 }
 0x248   :  { %v1184_v41 = vadd.f32 %v1183_v40, %v1182_v38 }
 0x249   :  { %v1185_v42 = vpop.f32.mrf.mxu1 }
 0x24a   :  { %v516_v43 = vadd.f32 %v1184_v41, %v1116_v39 }
 0x24b   :  { %v1186_v44 = vpop.f32.mrf.mxu1 }
 0x24c   :  { %v522_v45 = vmul.f32 0.70710677, %v516_v43  ;;  %v521_v3 = vmul.f32 0.5, %v516_v43 }
 0x24e   :  { %v525_v46 = vand.u32 2147483647, %v522_v45  ;;  %vm523_vm4 = vcmp.ge.f32.partialorder %v522_v45, 0.0 }
 0x24f   :  { %v524_v1 = vsel %vm523_vm4, 1.0, %v1603_v14 }
 0x250   :  { %v526_v47 = vmul.f32 0.3275911, %v525_v46  ;;  %v539_v49 = vsub.f32 0.0, %v525_v46 }
 0x252   :  { %v527_v48 = vadd.f32 1.0, %v526_v47  ;;  %v540_v50 = vmul.f32 %v539_v49, %v525_v46  ;;  %v1145_v46 = vld [vmem:[#allocation11] ss:$0 sm:$0xff] }
 0x254   :  { %1341 = vrcp.f32 %v527_v48  ;;  %v541_v53 = vmul.f32 1.442695, %v540_v50 }
 0x256   :  { %1343 = vpow2.f32 %v541_v53 }
 0x261   :  { %v1342_v51 = vpop.eup %1341 }
 0x262   :  { %v530_v52 = vmul.f32 1.0614054, %v1342_v51 }
 0x263   :  { %v1344_v62 = vpop.eup %1343 }
 0x264   :  { %v531_v54 = vadd.f32 -1.4531521, %v530_v52 }
 0x266   :  { %v532_v55 = vmul.f32 %v1342_v51, %v531_v54 }
 0x268   :  { %v533_v56 = vadd.f32 1.4214138, %v532_v55 }
 0x26a   :  { %v534_v57 = vmul.f32 %v1342_v51, %v533_v56 }
 0x26c   :  { %v535_v58 = vadd.f32 -0.28449672, %v534_v57 }
 0x26e   :  { %v536_v59 = vmul.f32 %v1342_v51, %v535_v58 }
 0x270   :  { %v537_v60 = vadd.f32 0.2548296, %v536_v59 }
 0x272   :  { %v538_v61 = vmul.f32 %v1342_v51, %v537_v60 }
 0x274   :  { %v543_v63 = vmul.f32 %v1344_v62, %v538_v61  ;;  %v1146_v61 = vld [vmem:[#allocation14] ss:$0 sm:$0xff] }
 0x276   :  { %v544_v0 = vsub.f32 1.0, %v543_v63  ;;  %v1147_v63 = vld [vmem:[%s1925_s10] ss:$0 sm:$0xff] }
 0x278   :  { %v545_v2 = vmul.f32 %v544_v0, %v524_v1 }
 0x27a   :  { %v546_v4 = vadd.f32 1.0, %v545_v2 }
 0x27c   :  { %v547_v5 = vmul.f32 %v546_v4, %v521_v3 }
 0x27e   :  { %v548_v6 = vpack.c.bf16 %v547_v5, %v547_v5 }
 0x280   :  { %1228 = vmatmul.mubr.bf16.vlgmr.msra.gmra.mxu0 %v548_v6 }
 0x281   :  { %1255 = vmatprep.mubr.msk.bf16.mxu0 %vm1605_vm3, %v1604_v30 }
 0x340   :  { %v654_v9 = vpop.f32.mrf.mxu0 }
 0x341   :  { %v655_v10 = vadd.f32 %v1133_v8, %v654_v9  ;;  %v1325_v9 = vld [vmem:[#allocation16 + $0x8] sm:$0xff]  }
 0x342   :  { %v1229_v11 = vpop.f32.mrf.mxu0 }
 0x343   :  { %v661_v12 = vmul.f32 0.70710677, %v655_v10  ;;  %v660_v39 = vmul.f32 0.5, %v655_v10  ;;  %v1326_v10 = vld [vmem:[#allocation16] sm:$0xff]  }
 0x344   :  { %v657_v13 = vpop.f32.mrf.mxu0  ;;  %v1327_v11 = vld [vmem:[%s1930_s15 + $0x18] sm:$0xff]  }
 0x345   :  { %v664_v15 = vand.u32 2147483647, %v661_v12  ;;  %vm662_vm5 = vcmp.ge.f32.partialorder %v661_v12, 0.0  ;;  %1248 = vmatpush3.bf16.msra.mxu0 %v1327_v11  ;;  %v1328_v12 = vld [vmem:[%s1930_s15 + $0x10] sm:$0xff]  }
 0x346   :  { %v1230_v16 = vpop.f32.mrf.mxu0  ;;  %v663_v37 = vsel %vm662_vm5, 1.0, %v1603_v14  ;;  %1249 = vmatprep.subr.bf16.mxu0 %v1604_v30 }
 0x347   :  { %v665_v17 = vmul.f32 0.3275911, %v664_v15  ;;  %v678_v19 = vsub.f32 0.0, %v664_v15 }
 0x349   :  { %v666_v18 = vadd.f32 1.0, %v665_v17  ;;  %v679_v20 = vmul.f32 %v678_v19, %v664_v15  ;;  %1250 = vmatpush3.bf16.msra.mxu0 %v1328_v12 }
 0x34a   :  { %1251 = vmatprep.subr.bf16.mxu0 %v1604_v30 }
 0x34b   :  { %1345 = vrcp.f32 %v666_v18  ;;  %v680_v22 = vmul.f32 1.442695, %v679_v20  ;;  %v1148_v18 = vld [vmem:[%s1926_s11] ss:$0 sm:$0xff] }
 0x34c   :  { %v1149_v20 = vld [vmem:[%s1927_s12] ss:$0 sm:$0xff] }
 0x34d   :  { %1347 = vpow2.f32 %v680_v22 }
 0x358   :  { %v1346_v21 = vpop.eup %1345 }
 0x359   :  { %v669_v23 = vmul.f32 1.0614054, %v1346_v21 }
 0x35a   :  { %v1348_v34 = vpop.eup %1347 }
 0x35b   :  { %v670_v24 = vadd.f32 -1.4531521, %v669_v23 }
 0x35d   :  { %v671_v25 = vmul.f32 %v1346_v21, %v670_v24  ;;  %v1329_v24 = vld [vmem:[%s1930_s15 + $0x8] sm:$0xff]  }
 0x35e   :  { %1252 = vmatpush3.bf16.msra.mxu0 %v1329_v24 }
 0x35f   :  { %v672_v26 = vadd.f32 1.4214138, %v671_v25  ;;  %1253 = vmatprep.subr.bf16.mxu0 %v1604_v30  ;;  %v1330_v25 = vld [vmem:[%s1930_s15] sm:$0xff]  }
 0x361   :  { %v673_v27 = vmul.f32 %v1346_v21, %v672_v26  ;;  %v1150_v26 = vld [vmem:[%s1929_s14] ss:$0 sm:$0xff] }
 0x362   :  { %1254 = vmatpush3.bf16.msra.mxu0 %v1330_v25 }
 0x363   :  { %v674_v28 = vadd.f32 -0.28449672, %v673_v27 }
 0x365   :  { %v675_v29 = vmul.f32 %v1346_v21, %v674_v28 }
 0x367   :  { %v676_v31 = vadd.f32 0.2548296, %v675_v29 }
 0x369   :  { %v677_v32 = vmul.f32 %v1346_v21, %v676_v31 }
 0x36b   :  { %v682_v35 = vmul.f32 %v1348_v34, %v677_v32 }
 0x36d   :  { %v683_v36 = vsub.f32 1.0, %v682_v35  ;;  %v1154_v35 = vld [vmem:[%s1931_s16] ss:$0 sm:$0xff] }
 0x36f   :  { %v684_v38 = vmul.f32 %v683_v36, %v663_v37 }
 0x371   :  { %v685_v40 = vadd.f32 1.0, %v684_v38 }
 0x373   :  { %v686_v41 = vmul.f32 %v685_v40, %v660_v39 }
 0x375   :  { %688 = vrot.lane.b32.xlu0 %v686_v41, %s1606_s30 }
 0x3e7   :  { %v689_v42 = vpop.permute.xlu0 %688 }
 0x3e8   :  { %v691_v43 = vadd.f32 %v689_v42, %v686_v41 }
 0x3ea   :  { %v692_v44 = vmul.f32 0.5, %v691_v43 }
 0x3ec   :  { %v693_v45 = vpack.c.bf16 %v692_v44, %v692_v44 }
 0x3ee   :  { %1236 = vmatmul.mubr.msk.bf16.vlgmr.msra.gmra.mxu1 %vm710_vm6, %v693_v45 }
 0x3ef   :  { %1243 = vmatprep.mubr.msk.bf16.mxu1 %vm1605_vm3, %v1604_v30  ;;  %1240 = vmatpush3.bf16.msra.mxu1 %v1325_v9 }
 0x3f0   :  { %1241 = vmatprep.subr.bf16.mxu1 %v1604_v30 }
 0x3f3   :  { %1242 = vmatpush3.bf16.msra.mxu1 %v1326_v10 }
 0x3f4   :  { %1259 = vmatprep.subr.bf16.mxu1 %v1604_v30 }
 0x4ae   :  { %v748_v47 = vpop.f32.mrf.mxu1 }
 0x4af   :  { %v761_v14 = vmul.f32 %v1145_v46, %v748_v47 }
 0x4b0   :  { %v1237_v48 = vpop.f32.mrf.mxu1 }
 0x4b1   :  { %v765_v49 = vsel %vm764_vm7, %v761_v14, 0.0  ;;  %v1332_v48 = vld [vmem:[%s1934_s19] sm:$0xff]  }
 0x4b2   :  { %766 = vadd.xlane.f32.xlu0 %v765_v49  ;;  %v751_v50 = vpop.f32.mrf.mxu1 }
 0x4b4   :  { %v1238_v51 = vpop.f32.mrf.mxu1 }
 0x53b   :  { %v767_v52 = vpop.xlane.xlu0 %766 }
 0x53c   :  { %v769_v53 = vmul.f32 0.03125, %v767_v52 }
 0x53e   :  { %v770_v54 = vsub.f32 %v761_v14, %v769_v53  ;;  %v1331_v14 = vld [vmem:[%s1934_s19 + $0x8] sm:$0xff]   ;;  %v1160_v53 = vld [vmem:[%s1932_s17] ss:$0 sm:$0xff]  ;;  %s1607_s19 = smov [#allocation17]  }
 0x53f   :  { %s1080_s26 = sshll.u32 %s1607_s19, 4  ;;  %s1081_s26 = int_to_ptr.vmem [resolvable:$true] %s1080_s26 }
 0x540   :  { %v771_v55 = vmul.f32 %v770_v54, %v770_v54  ;;  %s1535_s10 = scalar_lea.vmem %s1081_s26, 32  ;;  %p1540_p4 = scmp.lt.s32.totalorder %s1081_s26, %s1081_s26 }
 0x541   :  { %p1536_p3 = scmp.ne.s32.totalorder %s1081_s26, %s1535_s10  ;;  %p1541_p5 = scmp.lt.s32.totalorder %s1535_s10, %s1535_s10 }
 0x542   :  { %v772_v56 = vsel %vm764_vm7, %v771_v55, 0.0  ;;  %v1161_v55 = vld [vmem:[%s1933_s18] ss:$0 sm:$0xff] }
 0x543   :  { %773 = vadd.xlane.f32.xlu1 %v772_v56  ;;  %p1542_p6 = por %p1541_p5, %p1540_p4 }
 0x545   :  { %p1543_p7 = pnand %p1542_p6, %p1536_p3 }
 0x5cc   :  { %v774_v57 = vpop.xlane.xlu1 %773 }
 0x5cd   :  { %v775_v58 = vmul.f32 0.03125, %v774_v57 }
 0x5cf   :  { %v776_v59 = vadd.f32 1e-05, %v775_v58 }
 0x5d1   :  { %1349 = vrsqrt.f32 %v776_v59 }
 0x5de   :  { %v1350_v60 = vpop.eup %1349 }
 0x5df   :  { %v778_v62 = vmul.f32 %v1350_v60, %v770_v54 }
 0x5e1   :  { %v785_v0 = vmul.f32 %v1146_v61, %v778_v62 }
 0x5e3   :  { %v792_v1 = vadd.f32 %v1147_v63, %v785_v0 }
 0x5e5   :  { %v793_v2 = vadd.f32 %v792_v1, %v692_v44 }
 0x5e7   :  { %v796_v3 = vsel %vm764_vm7, %v793_v2, 0.0 }
 0x5e8   :  { %797 = vadd.xlane.f32.xlu1 %v796_v3 }
 0x671   :  { %v798_v4 = vpop.xlane.xlu1 %797 }
 0x672   :  { %v799_v5 = vmul.f32 0.03125, %v798_v4 }
 0x674   :  { %v800_v6 = vsub.f32 %v793_v2, %v799_v5 }
 0x676   :  { %v801_v7 = vmul.f32 %v800_v6, %v800_v6 }
 0x678   :  { %v802_v8 = vsel %vm764_vm7, %v801_v7, 0.0 }
 0x679   :  { %803 = vadd.xlane.f32.xlu1 %v802_v8 }
 0x702   :  { %v804_v13 = vpop.xlane.xlu1 %803 }
 0x703   :  { %v805_v15 = vmul.f32 0.03125, %v804_v13 }
 0x705   :  { %v806_v16 = vadd.f32 1e-05, %v805_v15 }
 0x707   :  { %1351 = vrsqrt.f32 %v806_v16 }
 0x714   :  { %v1352_v17 = vpop.eup %1351 }
 0x715   :  { %v808_v19 = vmul.f32 %v1352_v17, %v800_v6 }
 0x717   :  { %v815_v21 = vmul.f32 %v1148_v18, %v808_v19 }
 0x719   :  { %v822_v22 = vadd.f32 %v1149_v20, %v815_v21 }
 0x71b   :  { %v823_v23 = vpack.c.bf16 %v822_v22, %v822_v22 }
 0x71d   :  { %1244 = vmatmul.mubr.msk.bf16.vlgmr.msra.gmra.mxu1 %vm710_vm6, %v823_v23 }
 0x71e   :  { %1263 = vmatprep.mubr.msk.bf16.mxu1 %vm1605_vm3, %v1604_v30  ;;  %1260 = vmatpush3.bf16.msra.mxu1 %v1331_v14 }
 0x71f   :  { %1261 = vmatprep.subr.bf16.mxu1 %v1604_v30 }
 0x722   :  { %1262 = vmatpush3.bf16.msra.mxu1 %v1332_v48 }
 0x7dd   :  { %v884_v27 = vpop.f32.mrf.mxu1 }
 0x7de   :  { %v885_v28 = vadd.f32 %v1150_v26, %v884_v27 }
 0x7df   :  { %v1245_v29 = vpop.f32.mrf.mxu1 }
 0x7e0   :  { %v890_v31 = vmax.f32 %v885_v28, 0.0 }
 0x7e1   :  { %v887_v32 = vpop.f32.mrf.mxu1 }
 0x7e2   :  { %v891_v33 = vpack.c.bf16 %v890_v31, %v890_v31 }
 0x7e3   :  { %v1246_v34 = vpop.f32.mrf.mxu1 }
 0x7e4   :  { %1256 = vmatmul.mubr.msk.bf16.vlgmr.msra.gmra.mxu0 %vm245_vm0, %v891_v33 }
 0x8a4   :  { %v968_v36 = vpop.f32.mrf.mxu0 }
 0x8a5   :  { %v969_v37 = vadd.f32 %v1154_v35, %v968_v36 }
 0x8a6   :  { %v1257_v38 = vpop.f32.mrf.mxu0 }
 0x8a7   :  { %v974_v39 = vadd.f32 %v969_v37, %v822_v22 }
 0x8a8   :  { %v971_v40 = vpop.f32.mrf.mxu0 }
 0x8a9   :  { %v977_v41 = vsel %vm764_vm7, %v974_v39, 0.0 }
 0x8aa   :  { %978 = vadd.xlane.f32.xlu1 %v977_v41  ;;  %v1258_v42 = vpop.f32.mrf.mxu0 }
 0x933   :  { %v979_v43 = vpop.xlane.xlu1 %978 }
 0x934   :  { %v980_v44 = vmul.f32 0.03125, %v979_v43 }
 0x936   :  { %v981_v45 = vsub.f32 %v974_v39, %v980_v44 }
 0x938   :  { %v982_v46 = vmul.f32 %v981_v45, %v981_v45 }
 0x93a   :  { %v983_v47 = vsel %vm764_vm7, %v982_v46, 0.0 }
 0x93b   :  { %984 = vadd.xlane.f32.xlu1 %v983_v47 }
 0x9c4   :  { %v985_v49 = vpop.xlane.xlu1 %984 }
 0x9c5   :  { %v986_v50 = vmul.f32 0.03125, %v985_v49 }
 0x9c7   :  { %v987_v51 = vadd.f32 1e-05, %v986_v50 }
 0x9c9   :  { %1353 = vrsqrt.f32 %v987_v51 }
 0x9d6   :  { %v1354_v52 = vpop.eup %1353 }
 0x9d7   :  { %v989_v54 = vmul.f32 %v1354_v52, %v981_v45 }
 0x9d9   :  { %v996_v56 = vmul.f32 %v1160_v53, %v989_v54 }
 0x9db   :  { %v1003_v57 = vadd.f32 %v1161_v55, %v996_v56 }
 0x9dd   :  { %v1005_v58 = vpack.c.bf16 %v1003_v57, %v1003_v57  ;;  %1004 = vst.msk [vmem:[#allocation17] sm:$0x3] %vm764_vm7, %v1003_v57 }
 0x9df   :  { %1264 = vmatmul.mubr.msk.bf16.vlgmr.msra.gmra.mxu1 %vm710_vm6, %v1005_v58 }
 0x9e0   :  { %1546 = shalt.err (!%p1543_p7)
}
 0x9e1   :  { %1083 = dma.vmem_to_hbm [thread:$0]  %s1081_s26, 32, %s1936_s21, [#allocation4]   ;;  %v1162_v30 = vld [vmem:[%s1935_s20] ss:$0 sm:$0xff]  ;;  %vm1072_vm8 = vcmask 33792  }
 0x9e2   :  { %s1608_s1 = smov [#allocation18]  }
 0x9e3   :  { %s1090_s5 = sshll.u32 %s1608_s1, 4  ;;  %s1091_s5 = int_to_ptr.vmem [resolvable:$true] %s1090_s5 }
 0x9e4   :  { %s1555_s8 = scalar_lea.vmem %s1091_s5, 32  ;;  %p1560_p9 = scmp.lt.s32.totalorder %s1091_s5, %s1091_s5 }
 0x9e5   :  { %p1556_p8 = scmp.ne.s32.totalorder %s1091_s5, %s1555_s8  ;;  %p1561_p10 = scmp.lt.s32.totalorder %s1555_s8, %s1555_s8 }
 0x9e7   :  { %p1562_p11 = por %p1561_p10, %p1560_p9 }
 0x9e9   :  { %p1563_p12 = pnand %p1562_p11, %p1556_p8 }
 0xa9f   :  { %v1066_v59 = vpop.f32.mrf.mxu1 }
 0xaa0   :  { %v1067_v60 = vadd.f32 %v1162_v30, %v1066_v59 }
 0xaa1   :  { %v1265_v61 = vpop.f32.mrf.mxu1 }
 0xaa2   :  { %1073 = vst.msk [vmem:[#allocation18] sm:$0x3] %vm1072_vm8, %v1067_v60 }
 0xaa3   :  { %v1069_v62 = vpop.f32.mrf.mxu1 }
 0xaa4   :  { %1566 = shalt.err (!%p1563_p12)
}
 0xaa5   :  { %1093 = dma.vmem_to_hbm [thread:$0]  %s1091_s5, 32, %s1937_s22, [#allocation19]   ;;  %v1266_v63 = vpop.f32.mrf.mxu1 }
 0xaa6   :  { %1585 = dma.done.wait [#allocation4], 32  }
 0xaa7   :  { %1586 = vsyncadd [#allocation4], 4294967264 }
 0xaa8   :  { %1587 = dma.done.wait [#allocation19], 32  }
 0xaa9   :  { %1588 = vsyncadd [#allocation19], 4294967264 }
 0xaaa   :  { %1100 = vsyncpa [#allocation3], 1 }
 0xaab   :  { %1101 = vsyncpa [#allocation6], 1 }
 0xaac   :  { %1102 = vsyncpa [#allocation9], 1 }
 0xaad   :  { %1103 = vsyncpa [#allocation12], 1 }
 0xaae   :  { %1104 = vsyncpa [#allocation15], 1 }
 0xaaf   :  { %1105 = vsyncpa [#allocation4], 1 }
 0xab0   :  { %1106 = vsyncpa [#allocation19], 1 }

</bundles_post_ra>
